<compile_context>
chip_gen: v7x
topology: tpu7x:2x2x1
jax: 0.10.0
libtpu: 0.0.40
codegen_flags: <defaults>
</compile_context>

<pallas_src>
import jax
import jax.numpy as jnp
from jax.experimental import pallas as pl
from jax.experimental.pallas import tpu as pltpu

IN_DIM = 344
H1 = 200
H2 = 100
LATENT = 10

IN_PAD = 384    # 344 -> 3*128
H1_PAD = 256    # 200 -> 2*128
H2_PAD = 128    # 100 -> 128
SURV_PAD = 128  # lane-dense surv output slab


def _round_up(n, m):
    return ((n + m - 1) // m) * m


def _pad2(a, rows, cols):
    return jnp.pad(a, ((0, rows - a.shape[0]), (0, cols - a.shape[1])))


def ae_combined_kernel(
    x_ref,
    ew1_ref, eb1_ref, ew2_ref, eb2_ref, ew3_ref, eb3_ref,   # encoder
    rw_ref, rb_ref,                                          # regressor
    dw1_ref, db1_ref, dw2_ref, db2_ref, dw3_ref, db3_ref,    # decoder
    surv_ref, dec_ref,
):
    f32 = jnp.float32
    bf16 = jnp.bfloat16

    x = x_ref[...]                                           # (TM, IN_PAD) f32

    # ---- encoder: Linear(344,200) -> [Dropout] -> ReLU -> Linear(200,100)
    #               -> [Dropout] -> ReLU -> Linear(100,10)
    h = jnp.dot(x.astype(bf16), ew1_ref[...],
                preferred_element_type=f32) + eb1_ref[...]
    h = jnp.maximum(h, 0.0)
    h = jnp.dot(h.astype(bf16), ew2_ref[...],
                preferred_element_type=f32) + eb2_ref[...]
    h = jnp.maximum(h, 0.0)
    lspace = jnp.dot(h.astype(bf16), ew3_ref[...],
                     preferred_element_type=f32) + eb3_ref[...]   # (TM, LATENT) f32

    # ---- regressor: Linear(10, 1) — VPU multiply + lane-reduce (no N=1 MXU matmul),
    #      rb scalar from SMEM, output stored lane-dense (broadcast) and sliced later.
    surv = jnp.sum(lspace * rw_ref[...], axis=-1, keepdims=True) + rb_ref[0, 0]
    surv_ref[...] = jnp.broadcast_to(surv, surv_ref.shape)

    # ---- decoder: Linear(10,100) -> [Dropout] -> ReLU -> Linear(100,200)
    #               -> [Dropout] -> ReLU -> Linear(200,344)
    d = jnp.dot(lspace.astype(bf16), dw1_ref[...],
                preferred_element_type=f32) + db1_ref[...]
    d = jnp.maximum(d, 0.0)
    d = jnp.dot(d.astype(bf16), dw2_ref[...],
                preferred_element_type=f32) + db2_ref[...]
    d = jnp.maximum(d, 0.0)
    dec_ref[...] = jnp.dot(d.astype(bf16), dw3_ref[...],
                           preferred_element_type=f32) + db3_ref[...]


def prepare_params(params):
    """Pad lane dims to 128 multiples (exact: zero pad) and cast matmul weights to bf16."""
    (ew1, eb1, ew2, eb2, ew3, eb3,
     rw, rb, dw1, db1, dw2, db2, dw3, db3) = params
    bf16 = jnp.bfloat16
    return (
        _pad2(ew1, IN_PAD, H1_PAD).astype(bf16), _pad2(eb1, 1, H1_PAD),
        _pad2(ew2, H1_PAD, H2_PAD).astype(bf16), _pad2(eb2, 1, H2_PAD),
        _pad2(ew3, H2_PAD, LATENT).astype(bf16), eb3,
        rw.T,                                    # (1, LATENT) f32 — VPU path
        rb,                                      # (1, 1) f32     — SMEM scalar
        _pad2(dw1, LATENT, H2_PAD).astype(bf16), _pad2(db1, 1, H2_PAD),
        _pad2(dw2, H2_PAD, H1_PAD).astype(bf16), _pad2(db2, 1, H1_PAD),
        _pad2(dw3, H1_PAD, IN_PAD).astype(bf16), _pad2(db3, 1, IN_PAD),
    )


def ae_combined_forward(x, kparams, *, tm=256):
    """x: (B, 344) f32; kparams from prepare_params(). Returns (surv (B,1), dec (B,344))."""
    B = x.shape[0]
    TM = min(tm, _round_up(B, 8))
    B_pad = _round_up(B, TM)
    grid = (B_pad // TM,)

    x_p = jnp.pad(x.astype(jnp.float32),
                  ((0, B_pad - B), (0, IN_PAD - IN_DIM)))

    def const_spec(a):
        # Whole-array block, constant index map -> stays VMEM-resident across the grid.
        return pl.BlockSpec(a.shape, lambda i: (0, 0))

    (ew1, eb1, ew2, eb2, ew3, eb3,
     rw, rb, dw1, db1, dw2, db2, dw3, db3) = kparams

    in_specs = [
        pl.BlockSpec((TM, IN_PAD), lambda i: (i, 0)),                 # x
        const_spec(ew1), const_spec(eb1),
        const_spec(ew2), const_spec(eb2),
        const_spec(ew3), const_spec(eb3),
        const_spec(rw),
        pl.BlockSpec((1, 1), lambda i: (0, 0),
                     memory_space=pltpu.MemorySpace.SMEM),            # rb scalar
        const_spec(dw1), const_spec(db1),
        const_spec(dw2), const_spec(db2),
        const_spec(dw3), const_spec(db3),
    ]
    out_specs = (
        pl.BlockSpec((TM, SURV_PAD), lambda i: (i, 0)),               # surv (lane-dense)
        pl.BlockSpec((TM, IN_PAD), lambda i: (i, 0)),                 # dec  (lane-dense)
    )

    flops = 2 * B * (IN_DIM * H1 + H1 * H2 + H2 * LATENT + LATENT
                     + LATENT * H2 + H2 * H1 + H1 * IN_DIM)
    param_bytes = sum(int(p.size) * p.dtype.itemsize for p in kparams)
    bytes_accessed = (int(x_p.size) * 4 + B_pad * SURV_PAD * 4
                      + B_pad * IN_PAD * 4 + param_bytes)

    surv_p, dec_p = pl.pallas_call(
        ae_combined_kernel,
        out_shape=(
            jax.ShapeDtypeStruct((B_pad, SURV_PAD), jnp.float32),
            jax.ShapeDtypeStruct((B_pad, IN_PAD), jnp.float32),
        ),
        grid=grid,
        in_specs=in_specs,
        out_specs=out_specs,
        compiler_params=pltpu.CompilerParams(
            dimension_semantics=("parallel",)),
        cost_estimate=pl.CostEstimate(
            flops=flops, transcendentals=0, bytes_accessed=bytes_accessed),
    )(x_p, *kparams)

    return surv_p[:B, :1], dec_p[:B, :IN_DIM]


def init_params(key):
    """Deterministic init; weights stored (in, out) f32, biases (1, out) f32."""
    dims = [
        (IN_DIM, H1), (H1, H2), (H2, LATENT),   # encoder
        (LATENT, 1),                            # regressor
        (LATENT, H2), (H2, H1), (H1, IN_DIM),   # decoder
    ]
    params = []
    for i, (fi, fo) in enumerate(dims):
        kw, kb = jax.random.split(jax.random.fold_in(key, i))
        bound = 1.0 / jnp.sqrt(fi)
        w = jax.random.uniform(kw, (fi, fo), jnp.float32, -bound, bound)
        b = jax.random.uniform(kb, (1, fo), jnp.float32, -bound, bound)
        params += [w, b]
    return params


def reference_forward(x, params):
    """Pure-JAX reference matching the kernel numerics (bf16 matmul inputs, f32 acc)."""
    (ew1, eb1, ew2, eb2, ew3, eb3,
     rw, rb, dw1, db1, dw2, db2, dw3, db3) = params
    bf16, f32 = jnp.bfloat16, jnp.float32

    def lin(a, w, b):
        return jnp.dot(a.astype(bf16), w.astype(bf16),
                       preferred_element_type=f32) + b

    h = jnp.maximum(lin(x, ew1, eb1), 0.0)
    h = jnp.maximum(lin(h, ew2, eb2), 0.0)
    z = lin(h, ew3, eb3)
    surv = z @ rw + rb
    d = jnp.maximum(lin(z, dw1, db1), 0.0)
    d = jnp.maximum(lin(d, dw2, db2), 0.0)
    dec = lin(d, dw3, db3)
    return surv, dec


if __name__ == "__main__":
    key = jax.random.PRNGKey(0)
    kx, kp = jax.random.split(key)

    B = 8
    x = jax.random.normal(kx, (B, IN_DIM), jnp.float32)
    params = init_params(kp)
    kparams = prepare_params(params)

    surv_out, dec_out = ae_combined_forward(x, kparams)
    jax.block_until_ready((surv_out, dec_out))

    surv_ref, dec_ref = reference_forward(x, params)
    assert surv_out.shape == (B, 1) and dec_out.shape == (B, IN_DIM)
    assert jnp.allclose(surv_out, surv_ref, atol=1e-3, rtol=1e-3)
    assert jnp.allclose(dec_out, dec_ref, atol=1e-3, rtol=1e-3)

    print("KERNEL_OK")
</pallas_src>

<mosaic_0001>
module attributes {stable_mosaic.version = 11 : i64} {
  func.func @ae_combined_kernel(%arg0: i32, %arg1: memref<8x384xf32, #tpu.memory_space<vmem>>, %arg2: memref<384x256xbf16, #tpu.memory_space<vmem>>, %arg3: memref<1x256xf32, #tpu.memory_space<vmem>>, %arg4: memref<256x128xbf16, #tpu.memory_space<vmem>>, %arg5: memref<1x128xf32, #tpu.memory_space<vmem>>, %arg6: memref<128x10xbf16, #tpu.memory_space<vmem>>, %arg7: memref<1x10xf32, #tpu.memory_space<vmem>>, %arg8: memref<1x10xf32, #tpu.memory_space<vmem>>, %arg9: memref<1x1xf32, #tpu.memory_space<smem>>, %arg10: memref<10x128xbf16, #tpu.memory_space<vmem>>, %arg11: memref<1x128xf32, #tpu.memory_space<vmem>>, %arg12: memref<128x256xbf16, #tpu.memory_space<vmem>>, %arg13: memref<1x256xf32, #tpu.memory_space<vmem>>, %arg14: memref<256x384xbf16, #tpu.memory_space<vmem>>, %arg15: memref<1x384xf32, #tpu.memory_space<vmem>>, %arg16: memref<8x128xf32, #tpu.memory_space<vmem>>, %arg17: memref<8x384xf32, #tpu.memory_space<vmem>>) attributes {dimension_semantics = [#tpu.dimension_semantics<parallel>], iteration_bounds = array<i64: 1>, scalar_prefetch = 0 : i64, scratch_operands = 0 : i64, tpu.core_type = #tpu.core_type<tc>, window_params = [{transform_indices = @transform_0, window_bounds = array<i64: 8, 384>}, {pipeline_mode = #tpu.pipeline_mode<synchronous>, transform_indices = @transform_1, window_bounds = array<i64: 384, 256>}, {pipeline_mode = #tpu.pipeline_mode<synchronous>, transform_indices = @transform_2, window_bounds = array<i64: 1, 256>}, {pipeline_mode = #tpu.pipeline_mode<synchronous>, transform_indices = @transform_3, window_bounds = array<i64: 256, 128>}, {pipeline_mode = #tpu.pipeline_mode<synchronous>, transform_indices = @transform_4, window_bounds = array<i64: 1, 128>}, {pipeline_mode = #tpu.pipeline_mode<synchronous>, transform_indices = @transform_5, window_bounds = array<i64: 128, 10>}, {pipeline_mode = #tpu.pipeline_mode<synchronous>, transform_indices = @transform_6, window_bounds = array<i64: 1, 10>}, {pipeline_mode = #tpu.pipeline_mode<synchronous>, transform_indices = @transform_7, window_bounds = array<i64: 1, 10>}, {transform_indices = @transform_8, window_bounds = array<i64: 1, 1>}, {pipeline_mode = #tpu.pipeline_mode<synchronous>, transform_indices = @transform_9, window_bounds = array<i64: 10, 128>}, {pipeline_mode = #tpu.pipeline_mode<synchronous>, transform_indices = @transform_10, window_bounds = array<i64: 1, 128>}, {pipeline_mode = #tpu.pipeline_mode<synchronous>, transform_indices = @transform_11, window_bounds = array<i64: 128, 256>}, {pipeline_mode = #tpu.pipeline_mode<synchronous>, transform_indices = @transform_12, window_bounds = array<i64: 1, 256>}, {pipeline_mode = #tpu.pipeline_mode<synchronous>, transform_indices = @transform_13, window_bounds = array<i64: 256, 384>}, {pipeline_mode = #tpu.pipeline_mode<synchronous>, transform_indices = @transform_14, window_bounds = array<i64: 1, 384>}, {transform_indices = @transform_15, window_bounds = array<i64: 8, 128>}, {transform_indices = @transform_16, window_bounds = array<i64: 8, 384>}]} {
    %c0 = arith.constant 0 : index
    %c0_0 = arith.constant 0 : index
    %0 = vector.load %arg1[%c0, %c0_0] : memref<8x384xf32, #tpu.memory_space<vmem>>, vector<8x384xf32>
    %1 = arith.truncf %0 : vector<8x384xf32> to vector<8x384xbf16>
    %c0_1 = arith.constant 0 : index
    %c0_2 = arith.constant 0 : index
    %2 = vector.load %arg2[%c0_1, %c0_2] : memref<384x256xbf16, #tpu.memory_space<vmem>>, vector<384x256xbf16>
    %cst = arith.constant dense<0.000000e+00> : vector<8x256xf32>
    %3 = tpu.matmul %1, %2, %cst {dimension_numbers = #tpu.dot_dimension_numbers<[1], [0], [0], [1], [0, 0, 1, 1], [], []>} : vector<8x384xbf16>, vector<384x256xbf16>, vector<8x256xf32> -> vector<8x256xf32>
    %c0_3 = arith.constant 0 : index
    %c0_4 = arith.constant 0 : index
    %4 = vector.load %arg3[%c0_3, %c0_4] : memref<1x256xf32, #tpu.memory_space<vmem>>, vector<1x256xf32>
    %5 = vector.broadcast %4 : vector<1x256xf32> to vector<8x256xf32>
    %6 = arith.addf %3, %5 : vector<8x256xf32>
    %cst_5 = arith.constant 0.000000e+00 : f32
    %7 = vector.broadcast %cst_5 : f32 to vector<8x256xf32>
    %8 = arith.maximumf %6, %7 : vector<8x256xf32>
    %9 = arith.truncf %8 : vector<8x256xf32> to vector<8x256xbf16>
    %c0_6 = arith.constant 0 : index
    %c0_7 = arith.constant 0 : index
    %10 = vector.load %arg4[%c0_6, %c0_7] : memref<256x128xbf16, #tpu.memory_space<vmem>>, vector<256x128xbf16>
    %cst_8 = arith.constant dense<0.000000e+00> : vector<8x128xf32>
    %11 = tpu.matmul %9, %10, %cst_8 {dimension_numbers = #tpu.dot_dimension_numbers<[1], [0], [0], [1], [0, 0, 1, 1], [], []>} : vector<8x256xbf16>, vector<256x128xbf16>, vector<8x128xf32> -> vector<8x128xf32>
    %c0_9 = arith.constant 0 : index
    %c0_10 = arith.constant 0 : index
    %12 = vector.load %arg5[%c0_9, %c0_10] : memref<1x128xf32, #tpu.memory_space<vmem>>, vector<1x128xf32>
    %13 = vector.broadcast %12 : vector<1x128xf32> to vector<8x128xf32>
    %14 = arith.addf %11, %13 : vector<8x128xf32>
    %cst_11 = arith.constant 0.000000e+00 : f32
    %15 = vector.broadcast %cst_11 : f32 to vector<8x128xf32>
    %16 = arith.maximumf %14, %15 : vector<8x128xf32>
    %17 = arith.truncf %16 : vector<8x128xf32> to vector<8x128xbf16>
    %c0_12 = arith.constant 0 : index
    %c0_13 = arith.constant 0 : index
    %18 = vector.load %arg6[%c0_12, %c0_13] : memref<128x10xbf16, #tpu.memory_space<vmem>>, vector<128x10xbf16>
    %cst_14 = arith.constant dense<0.000000e+00> : vector<8x10xf32>
    %19 = tpu.matmul %17, %18, %cst_14 {dimension_numbers = #tpu.dot_dimension_numbers<[1], [0], [0], [1], [0, 0, 1, 1], [], []>} : vector<8x128xbf16>, vector<128x10xbf16>, vector<8x10xf32> -> vector<8x10xf32>
    %c0_15 = arith.constant 0 : index
    %c0_16 = arith.constant 0 : index
    %20 = vector.load %arg7[%c0_15, %c0_16] : memref<1x10xf32, #tpu.memory_space<vmem>>, vector<1x10xf32>
    %21 = vector.broadcast %20 : vector<1x10xf32> to vector<8x10xf32>
    %22 = arith.addf %19, %21 : vector<8x10xf32>
    %c0_17 = arith.constant 0 : index
    %c0_18 = arith.constant 0 : index
    %23 = vector.load %arg8[%c0_17, %c0_18] : memref<1x10xf32, #tpu.memory_space<vmem>>, vector<1x10xf32>
    %24 = vector.broadcast %23 : vector<1x10xf32> to vector<8x10xf32>
    %25 = arith.mulf %22, %24 : vector<8x10xf32>
    %cst_19 = arith.constant dense<0.000000e+00> : vector<8xf32>
    %26 = vector.multi_reduction <add>, %25, %cst_19 [1] : vector<8x10xf32> to vector<8xf32>
    %27 = vector.shape_cast %26 : vector<8xf32> to vector<8x1xf32>
    %c0_20 = arith.constant 0 : index
    %c0_21 = arith.constant 0 : index
    %28 = memref.load %arg9[%c0_20, %c0_21] : memref<1x1xf32, #tpu.memory_space<smem>>
    %29 = vector.broadcast %28 : f32 to vector<8x1xf32>
    %30 = arith.addf %27, %29 : vector<8x1xf32>
    %31 = vector.shape_cast %30 : vector<8x1xf32> to vector<8x1xf32>
    %32 = vector.broadcast %31 : vector<8x1xf32> to vector<8x128xf32>
    %c0_22 = arith.constant 0 : index
    %c0_23 = arith.constant 0 : index
    %33 = vector.load %arg16[%c0_22, %c0_23] : memref<8x128xf32, #tpu.memory_space<vmem>>, vector<8x128xf32>
    tpu.vector_store %arg16[%c0_22, %c0_23], %32 {strides = array<i32>} : memref<8x128xf32, #tpu.memory_space<vmem>>, vector<8x128xf32>,
    %34 = arith.truncf %22 : vector<8x10xf32> to vector<8x10xbf16>
    %c0_24 = arith.constant 0 : index
    %c0_25 = arith.constant 0 : index
    %35 = vector.load %arg10[%c0_24, %c0_25] : memref<10x128xbf16, #tpu.memory_space<vmem>>, vector<10x128xbf16>
    %cst_26 = arith.constant dense<0.000000e+00> : vector<8x128xf32>
    %36 = tpu.matmul %34, %35, %cst_26 {dimension_numbers = #tpu.dot_dimension_numbers<[1], [0], [0], [1], [0, 0, 1, 1], [], []>} : vector<8x10xbf16>, vector<10x128xbf16>, vector<8x128xf32> -> vector<8x128xf32>
    %c0_27 = arith.constant 0 : index
    %c0_28 = arith.constant 0 : index
    %37 = vector.load %arg11[%c0_27, %c0_28] : memref<1x128xf32, #tpu.memory_space<vmem>>, vector<1x128xf32>
    %38 = vector.broadcast %37 : vector<1x128xf32> to vector<8x128xf32>
    %39 = arith.addf %36, %38 : vector<8x128xf32>
    %cst_29 = arith.constant 0.000000e+00 : f32
    %40 = vector.broadcast %cst_29 : f32 to vector<8x128xf32>
    %41 = arith.maximumf %39, %40 : vector<8x128xf32>
    %42 = arith.truncf %41 : vector<8x128xf32> to vector<8x128xbf16>
    %c0_30 = arith.constant 0 : index
    %c0_31 = arith.constant 0 : index
    %43 = vector.load %arg12[%c0_30, %c0_31] : memref<128x256xbf16, #tpu.memory_space<vmem>>, vector<128x256xbf16>
    %cst_32 = arith.constant dense<0.000000e+00> : vector<8x256xf32>
    %44 = tpu.matmul %42, %43, %cst_32 {dimension_numbers = #tpu.dot_dimension_numbers<[1], [0], [0], [1], [0, 0, 1, 1], [], []>} : vector<8x128xbf16>, vector<128x256xbf16>, vector<8x256xf32> -> vector<8x256xf32>
    %c0_33 = arith.constant 0 : index
    %c0_34 = arith.constant 0 : index
    %45 = vector.load %arg13[%c0_33, %c0_34] : memref<1x256xf32, #tpu.memory_space<vmem>>, vector<1x256xf32>
    %46 = vector.broadcast %45 : vector<1x256xf32> to vector<8x256xf32>
    %47 = arith.addf %44, %46 : vector<8x256xf32>
    %cst_35 = arith.constant 0.000000e+00 : f32
    %48 = vector.broadcast %cst_35 : f32 to vector<8x256xf32>
    %49 = arith.maximumf %47, %48 : vector<8x256xf32>
    %50 = arith.truncf %49 : vector<8x256xf32> to vector<8x256xbf16>
    %c0_36 = arith.constant 0 : index
    %c0_37 = arith.constant 0 : index
    %51 = vector.load %arg14[%c0_36, %c0_37] : memref<256x384xbf16, #tpu.memory_space<vmem>>, vector<256x384xbf16>
    %cst_38 = arith.constant dense<0.000000e+00> : vector<8x384xf32>
    %52 = tpu.matmul %50, %51, %cst_38 {dimension_numbers = #tpu.dot_dimension_numbers<[1], [0], [0], [1], [0, 0, 1, 1], [], []>} : vector<8x256xbf16>, vector<256x384xbf16>, vector<8x384xf32> -> vector<8x384xf32>
    %c0_39 = arith.constant 0 : index
    %c0_40 = arith.constant 0 : index
    %53 = vector.load %arg15[%c0_39, %c0_40] : memref<1x384xf32, #tpu.memory_space<vmem>>, vector<1x384xf32>
    %54 = vector.broadcast %53 : vector<1x384xf32> to vector<8x384xf32>
    %55 = arith.addf %52, %54 : vector<8x384xf32>
    %c0_41 = arith.constant 0 : index
    %c0_42 = arith.constant 0 : index
    %56 = vector.load %arg17[%c0_41, %c0_42] : memref<8x384xf32, #tpu.memory_space<vmem>>, vector<8x384xf32>
    tpu.vector_store %arg17[%c0_41, %c0_42], %55 {strides = array<i32>} : memref<8x384xf32, #tpu.memory_space<vmem>>, vector<8x384xf32>,
    return
  }
  func.func @transform_0(%arg0: i32) -> (i32, i32) {
    %c0_i32 = arith.constant 0 : i32
    %c0_i32_0 = arith.constant 0 : i32
    return %arg0, %c0_i32 : i32, i32
  }
  func.func @transform_1(%arg0: i32) -> (i32, i32) {
    %c0_i32 = arith.constant 0 : i32
    %c0_i32_0 = arith.constant 0 : i32
    %c0_i32_1 = arith.constant 0 : i32
    return %c0_i32, %c0_i32_0 : i32, i32
  }
  func.func @transform_2(%arg0: i32) -> (i32, i32) {
    %c0_i32 = arith.constant 0 : i32
    %c0_i32_0 = arith.constant 0 : i32
    %c0_i32_1 = arith.constant 0 : i32
    return %c0_i32, %c0_i32_0 : i32, i32
  }
  func.func @transform_3(%arg0: i32) -> (i32, i32) {
    %c0_i32 = arith.constant 0 : i32
    %c0_i32_0 = arith.constant 0 : i32
    %c0_i32_1 = arith.constant 0 : i32
    return %c0_i32, %c0_i32_0 : i32, i32
  }
  func.func @transform_4(%arg0: i32) -> (i32, i32) {
    %c0_i32 = arith.constant 0 : i32
    %c0_i32_0 = arith.constant 0 : i32
    %c0_i32_1 = arith.constant 0 : i32
    return %c0_i32, %c0_i32_0 : i32, i32
  }
  func.func @transform_5(%arg0: i32) -> (i32, i32) {
    %c0_i32 = arith.constant 0 : i32
    %c0_i32_0 = arith.constant 0 : i32
    %c0_i32_1 = arith.constant 0 : i32
    return %c0_i32, %c0_i32_0 : i32, i32
  }
  func.func @transform_6(%arg0: i32) -> (i32, i32) {
    %c0_i32 = arith.constant 0 : i32
    %c0_i32_0 = arith.constant 0 : i32
    %c0_i32_1 = arith.constant 0 : i32
    return %c0_i32, %c0_i32_0 : i32, i32
  }
  func.func @transform_7(%arg0: i32) -> (i32, i32) {
    %c0_i32 = arith.constant 0 : i32
    %c0_i32_0 = arith.constant 0 : i32
    %c0_i32_1 = arith.constant 0 : i32
    return %c0_i32, %c0_i32_0 : i32, i32
  }
  func.func @transform_8(%arg0: i32) -> (i32, i32) {
    %c0_i32 = arith.constant 0 : i32
    %c0_i32_0 = arith.constant 0 : i32
    %c0_i32_1 = arith.constant 0 : i32
    return %c0_i32, %c0_i32_0 : i32, i32
  }
  func.func @transform_9(%arg0: i32) -> (i32, i32) {
    %c0_i32 = arith.constant 0 : i32
    %c0_i32_0 = arith.constant 0 : i32
    %c0_i32_1 = arith.constant 0 : i32
    return %c0_i32, %c0_i32_0 : i32, i32
  }
  func.func @transform_10(%arg0: i32) -> (i32, i32) {
    %c0_i32 = arith.constant 0 : i32
    %c0_i32_0 = arith.constant 0 : i32
    %c0_i32_1 = arith.constant 0 : i32
    return %c0_i32, %c0_i32_0 : i32, i32
  }
  func.func @transform_11(%arg0: i32) -> (i32, i32) {
    %c0_i32 = arith.constant 0 : i32
    %c0_i32_0 = arith.constant 0 : i32
    %c0_i32_1 = arith.constant 0 : i32
    return %c0_i32, %c0_i32_0 : i32, i32
  }
  func.func @transform_12(%arg0: i32) -> (i32, i32) {
    %c0_i32 = arith.constant 0 : i32
    %c0_i32_0 = arith.constant 0 : i32
    %c0_i32_1 = arith.constant 0 : i32
    return %c0_i32, %c0_i32_0 : i32, i32
  }
  func.func @transform_13(%arg0: i32) -> (i32, i32) {
    %c0_i32 = arith.constant 0 : i32
    %c0_i32_0 = arith.constant 0 : i32
    %c0_i32_1 = arith.constant 0 : i32
    return %c0_i32, %c0_i32_0 : i32, i32
  }
  func.func @transform_14(%arg0: i32) -> (i32, i32) {
    %c0_i32 = arith.constant 0 : i32
    %c0_i32_0 = arith.constant 0 : i32
    %c0_i32_1 = arith.constant 0 : i32
    return %c0_i32, %c0_i32_0 : i32, i32
  }
  func.func @transform_15(%arg0: i32) -> (i32, i32) {
    %c0_i32 = arith.constant 0 : i32
    %c0_i32_0 = arith.constant 0 : i32
    return %arg0, %c0_i32 : i32, i32
  }
  func.func @transform_16(%arg0: i32) -> (i32, i32) {
    %c0_i32 = arith.constant 0 : i32
    %c0_i32_0 = arith.constant 0 : i32
    return %arg0, %c0_i32 : i32, i32
  }
}

</mosaic_0001>

<bundles_post_ra>
// kernel: tpu_custom_call.1
= control target key start
LH: loop header
LB: loop body
LE: loop exit
PB: predicated region body
PF: predicated region fallthrough
CT: control target
= control target key end

     0   :  { %s2305_s0 = inlined_call_operand.vmem [shape: f32[8,384], index: 0, kind: input, shape index: {}]   ;;  %s2306_s1 = inlined_call_operand.hbm [shape: bf16[384,256], index: 1, kind: input, shape index: {}]   ;;  %s2307_s2 = inlined_call_operand.vmem [shape: f32[1,256], index: 2, kind: input, shape index: {}]   ;;  %s2308_s3 = inlined_call_operand.hbm [shape: bf16[256,128], index: 3, kind: input, shape index: {}]   ;;  %s2309_s4 = inlined_call_operand.vmem [shape: f32[1,128], index: 4, kind: input, shape index: {}]   ;;  %s2310_s5 = inlined_call_operand.vmem [shape: bf16[128,10], index: 5, kind: input, shape index: {}]   ;;  %s2311_s6 = inlined_call_operand.vmem [shape: f32[1,10], index: 6, kind: input, shape index: {}]   ;;  %s2312_s7 = inlined_call_operand.vmem [shape: f32[1,10], index: 7, kind: input, shape index: {}]   ;;  %s2313_s8 = inlined_call_operand.<no memory space> [shape: f32[1,1], index: 8, kind: input, shape index: {}]   ;;  %s2314_s9 = inlined_call_operand.vmem [shape: bf16[10,128], index: 9, kind: input, shape index: {}]   ;;  %s2315_s10 = inlined_call_operand.vmem [shape: f32[1,128], index: 10, kind: input, shape index: {}]   ;;  %s2316_s11 = inlined_call_operand.hbm [shape: bf16[128,256], index: 11, kind: input, shape index: {}]   ;;  %s2317_s12 = inlined_call_operand.vmem [shape: f32[1,256], index: 12, kind: input, shape index: {}]   ;;  %s2318_s13 = inlined_call_operand.hbm [shape: bf16[256,384], index: 13, kind: input, shape index: {}]   ;;  %s2319_s14 = inlined_call_operand.vmem [shape: f32[1,384], index: 14, kind: input, shape index: {}]   ;;  %s2320_s15 = inlined_call_operand.hbm [shape: f32[8,128], index: 15, kind: output, shape index: {0}]   ;;  %s2321_s16 = inlined_call_operand.hbm [shape: f32[8,384], index: 16, kind: output, shape index: {1}]  }
   0x1   :  { %2323 = sst [smem:[#allocation19_spill]] %s2305_s0 }
   0x2   :  { %23 = vsyncpa [#allocation4], 0 }
   0x3   :  { %24 = vsyncpa [#allocation7], 0 }
   0x4   :  { %25 = vsyncpa [#allocation10], 0 }
   0x5   :  { %26 = vsyncpa [#allocation5], 0 }
   0x6   :  { %27 = vsyncpa [#allocation13], 0  ;;  %s2047_s21 = smov [#allocation6]   ;;  %s1905_s25 = scalar_lea.hbm %s2308_s3, 2048 }
   0x7   :  { %s49_s22 = sshll.u32 %s2047_s21, 4  ;;  %p1906_p0 = scmp.ne.s32.totalorder %s2308_s3, %s1905_s25  ;;  %s50_s22 = int_to_ptr.vmem [resolvable:$true] %s49_s22 }
   0x8   :  { %p1909_p1 = scmp.lt.u32.totalorder %s1905_s25, %s2308_s3 }
   0xa   :  { %p1911_p2 = pnand %p1909_p1, %p1906_p0 }
   0xc   :  { %1914 = shalt.err (!%p1911_p2)
}
   0xd   :  { %s1915_s30 = scalar_lea.vmem %s50_s22, 2048  ;;  %p1920_p4 = scmp.lt.s32.totalorder %s50_s22, %s50_s22 }
   0xe   :  { %p1916_p3 = scmp.ne.s32.totalorder %s50_s22, %s1915_s30  ;;  %p1921_p5 = scmp.lt.s32.totalorder %s1915_s30, %s1915_s30 }
  0x10   :  { %p1922_p6 = por %p1921_p5, %p1920_p4 }
  0x12   :  { %p1923_p7 = pnand %p1922_p6, %p1916_p3 }
  0x14   :  { %1926 = shalt.err (!%p1923_p7)
}
  0x15   :  { %s2048_s0 = smov 64   ;;  %s2049_s17 = smov 4  }
  0x16   :  { %55 = dma.hbm_to_vmem [thread:$0]  %s2308_s3, 2048, %s50_s22, [#allocation7], %s2048_s0, %s2048_s0, %s2049_s17  }
  0x17   :  { %s2050_s20 = smov [#allocation3]   ;;  %s1927_s25 = scalar_lea.hbm %s2306_s1, 6144 }
  0x18   :  { %s35_s21 = sshll.u32 %s2050_s20, 4  ;;  %p1928_p8 = scmp.ne.s32.totalorder %s2306_s1, %s1927_s25  ;;  %s36_s21 = int_to_ptr.vmem [resolvable:$true] %s35_s21 }
  0x19   :  { %p1931_p9 = scmp.lt.u32.totalorder %s1927_s25, %s2306_s1 }
  0x1b   :  { %p1933_p10 = pnand %p1931_p9, %p1928_p8 }
  0x1d   :  { %1936 = shalt.err (!%p1933_p10)
}
  0x1e   :  { %s1937_s30 = scalar_lea.vmem %s36_s21, 6144  ;;  %p1942_p12 = scmp.lt.s32.totalorder %s36_s21, %s36_s21 }
  0x1f   :  { %p1938_p11 = scmp.ne.s32.totalorder %s36_s21, %s1937_s30  ;;  %p1943_p13 = scmp.lt.s32.totalorder %s1937_s30, %s1937_s30 }
  0x21   :  { %p1944_p0 = por %p1943_p13, %p1942_p12 }
  0x23   :  { %p1945_p1 = pnand %p1944_p0, %p1938_p11 }
  0x25   :  { %1948 = shalt.err (!%p1945_p1)
}
  0x26   :  { %s2051_s3 = smov 128   ;;  %s2052_s22 = smov 8  }
  0x27   :  { %41 = dma.hbm_to_vmem [thread:$0]  %s2306_s1, 6144, %s36_s21, [#allocation4], %s2051_s3, %s2051_s3, %s2052_s22  }
  0x28   :  { %s2053_s18 = smov [#allocation8]   ;;  %s2054_s20 = smov [#allocation9]  }
  0x29   :  { %s75_s19 = sshll.u32 %s2053_s18, 4  ;;  %s89_s23 = sshll.u32 %s2054_s20, 4  ;;  %s76_s19 = int_to_ptr.vmem [resolvable:$true] %s75_s19  ;;  %s2171_s23 = int_to_ptr.vmem [resolvable:$true] %s89_s23 }
  0x2a   :  { %s1949_s26 = scalar_lea.hbm %s2316_s11, 2048 }
  0x2b   :  { %p1950_p2 = scmp.ne.s32.totalorder %s2316_s11, %s1949_s26  ;;  %p1953_p3 = scmp.lt.u32.totalorder %s1949_s26, %s2316_s11 }
  0x2d   :  { %p1955_p4 = pnand %p1953_p3, %p1950_p2 }
  0x2f   :  { %1958 = shalt.err (!%p1955_p4)
}
  0x30   :  { %s1959_s1 = scalar_lea.vmem %s76_s19, 2048  ;;  %p1964_p6 = scmp.lt.s32.totalorder %s76_s19, %s76_s19 }
  0x31   :  { %p1960_p5 = scmp.ne.s32.totalorder %s76_s19, %s1959_s1  ;;  %p1965_p7 = scmp.lt.s32.totalorder %s1959_s1, %s1959_s1 }
  0x33   :  { %p1966_p8 = por %p1965_p7, %p1964_p6 }
  0x35   :  { %p1967_p9 = pnand %p1966_p8, %p1960_p5 }
  0x37   :  { %1970 = shalt.err (!%p1967_p9)
}
  0x38   :  { %81 = dma.hbm_to_vmem [thread:$0]  %s2316_s11, 2048, %s76_s19, [#allocation7], %s2051_s3, %s2051_s3, %s2052_s22  }
  0x39   :  { %s1971_s20 = scalar_lea.hbm %s2318_s13, 6144 }
  0x3a   :  { %p1972_p10 = scmp.ne.s32.totalorder %s2318_s13, %s1971_s20  ;;  %p1975_p11 = scmp.lt.u32.totalorder %s1971_s20, %s2318_s13 }
  0x3c   :  { %p1977_p12 = pnand %p1975_p11, %p1972_p10 }
  0x3e   :  { %1980 = shalt.err (!%p1977_p12)
}
  0x3f   :  { %s1981_s28 = scalar_lea.vmem %s2171_s23, 6144  ;;  %p1986_p0 = scmp.lt.s32.totalorder %s2171_s23, %s2171_s23 }
  0x40   :  { %p1982_p13 = scmp.ne.s32.totalorder %s2171_s23, %s1981_s28  ;;  %p1987_p1 = scmp.lt.s32.totalorder %s1981_s28, %s1981_s28 }
  0x42   :  { %p1988_p2 = por %p1987_p1, %p1986_p0 }
  0x44   :  { %p1989_p3 = pnand %p1988_p2, %p1982_p13 }
  0x46   :  { %1992 = shalt.err (!%p1989_p3)
}
  0x47   :  { %s2055_s11 = smov 192   ;;  %s2056_s3 = smov 12  }
  0x48   :  { %95 = dma.hbm_to_vmem [thread:$0]  %s2318_s13, 6144, %s2171_s23, [#allocation10], %s2055_s11, %s2055_s11, %s2056_s3  }
  0x49   :  { %2037 = dma.done.wait [#allocation4], 6144  }
  0x4a   :  { %2038 = vsyncadd [#allocation4], 4294961152 }
  0x4b   :  { %2039 = dma.done.wait [#allocation7], 4096  }
  0x4c   :  { %2040 = vsyncadd [#allocation7], 4294963200 }
  0x4d   :  { %2041 = dma.done.wait [#allocation10], 6144  }
  0x4e   :  { %2042 = vsyncadd [#allocation10], 4294961152  ;;  %v1720_v0 = vld [vmem:[#allocation3 + $0x4] ss:$8 sps:$4 sm:$0xff]   ;;  %v1722_v1 = vld [vmem:[#allocation3] ss:$8 sps:$4 sm:$0xff]  }
  0x4f   :  { %417 = vmatprep.subr.bf16.mxu0 %v1720_v0  ;;  %v1723_v2 = vld [vmem:[#allocation3 + $0x14] ss:$8 sps:$4 sm:$0xff]   ;;  %v1725_v3 = vld [vmem:[#allocation3 + $0x10] ss:$8 sps:$4 sm:$0xff]   ;;  %v1726_v4 = vld [vmem:[#allocation3 + $0x24] ss:$8 sps:$4 sm:$0xff]  }
  0x50   :  { %418 = vmatpush1.bf16.msra.mxu0 %v1722_v1  ;;  %v1728_v5 = vld [vmem:[#allocation3 + $0x20] ss:$8 sps:$4 sm:$0xff]   ;;  %v1729_v6 = vld [vmem:[#allocation3 + $0x34] ss:$8 sps:$4 sm:$0xff]   ;;  %v1731_v7 = vld [vmem:[#allocation3 + $0x30] ss:$8 sps:$4 sm:$0xff]  }
  0x51   :  { %419 = vmatprep.subr.bf16.mxu0 %v1723_v2  ;;  %v1732_v8 = vld [vmem:[#allocation3 + $0x44] ss:$8 sps:$4 sm:$0xff]   ;;  %v1734_v9 = vld [vmem:[#allocation3 + $0x40] ss:$8 sps:$4 sm:$0xff]   ;;  %v1735_v10 = vld [vmem:[#allocation3 + $0x54] ss:$8 sps:$4 sm:$0xff]  }
  0x52   :  { %v1737_v11 = vld [vmem:[#allocation3 + $0x50] ss:$8 sps:$4 sm:$0xff]   ;;  %v1738_v12 = vld [vmem:[#allocation3 + $0x64] ss:$8 sps:$4 sm:$0xff]   ;;  %s2324_s29 = sld [smem:[#allocation19_spill]]  ;;  %v2057_v53 = vmov 0  }
  0x53   :  { %v1740_v15 = vld [vmem:[#allocation3 + $0x60] ss:$8 sps:$4 sm:$0xff]   ;;  %v1741_v16 = vld [vmem:[#allocation3 + $0x74] ss:$8 sps:$4 sm:$0xff]   ;;  %v1743_v17 = vld [vmem:[#allocation3 + $0x70] ss:$8 sps:$4 sm:$0xff]  }
  0x54   :  { %420 = vmatpush1.bf16.msra.mxu0 %v1725_v3  ;;  %v1744_v18 = vld [vmem:[#allocation3 + $0x84] ss:$8 sps:$4 sm:$0xff]   ;;  %v1746_v19 = vld [vmem:[#allocation3 + $0x80] ss:$8 sps:$4 sm:$0xff]   ;;  %v1747_v20 = vld [vmem:[#allocation3 + $0x94] ss:$8 sps:$4 sm:$0xff]  }
  0x55   :  { %421 = vmatprep.subr.bf16.mxu0 %v1726_v4  ;;  %v1749_v21 = vld [vmem:[#allocation3 + $0x90] ss:$8 sps:$4 sm:$0xff]   ;;  %v1792_v22 = vld [vmem:[#allocation6 + $0x40] sm:$0xff]   ;;  %v1794_v25 = vld [vmem:[#allocation6 + $0x48] sm:$0xff]   ;;  %vm2059_vm0 = vmmov 0   ;;  %vm825_vm1 = vcmask 1044480  }
  0x56   :  { %v1750_v23 = vld [vmem:[#allocation3 + $0xa4] ss:$8 sps:$4 sm:$0xff]   ;;  %1618 = vmatprep.subr.bf16.mxu1 %v1792_v22  ;;  %v1796_v27 = vld [vmem:[#allocation6 + $0x50] sm:$0xff]   ;;  %v1752_v28 = vld [vmem:[#allocation3 + $0xa0] ss:$8 sps:$4 sm:$0xff]   ;;  %vm799_vm2 = vcmask 80896  }
  0x57   :  { %v1793_v24 = vld [vmem:[#allocation6] sm:$0xff]   ;;  %v1795_v26 = vld [vmem:[#allocation6 + $0x8] sm:$0xff]   ;;  %v1753_v29 = vld [vmem:[#allocation3 + $0xb4] ss:$8 sps:$4 sm:$0xff]   ;;  %s2060_s25 = smov [#allocation11]  }
  0x58   :  { %422 = vmatpush1.bf16.msra.mxu0 %v1728_v5  ;;  %v112_v13 = vld [vmem:[%s2324_s29 + $0x8] sm:$0xff]  ;;  %1619 = vmatpush3.bf16.msra.mxu1 %v1793_v24  ;;  %v1797_v30 = vld [vmem:[#allocation6 + $0x10] sm:$0xff]   ;;  %v1798_v31 = vld [vmem:[#allocation6 + $0x58] sm:$0xff]  }
  0x59   :  { %423 = vmatprep.subr.bf16.mxu0 %v1729_v6  ;;  %v115_v14 = vpack.c.bf16 %v112_v13, %v112_v13  ;;  %1620 = vmatprep.subr.bf16.mxu1 %v1794_v25  ;;  %v1755_v32 = vld [vmem:[#allocation3 + $0xb0] ss:$8 sps:$4 sm:$0xff]   ;;  %v1756_v33 = vld [vmem:[#allocation3 + $0xc4] ss:$8 sps:$4 sm:$0xff]   ;;  %v1758_v35 = vld [vmem:[#allocation3 + $0xc0] ss:$8 sps:$4 sm:$0xff]  }
  0x5a   :  { %v1799_v34 = vld [vmem:[#allocation6 + $0x18] sm:$0xff]   ;;  %v1800_v36 = vld [vmem:[#allocation6 + $0x60] sm:$0xff]   ;;  %v1802_v39 = vld [vmem:[#allocation6 + $0x68] sm:$0xff]  }
  0x5b   :  { %449 = vmatprep.mubr.bf16.mxu0 %v115_v14  ;;  %v1759_v37 = vld [vmem:[#allocation3 + $0xd4] ss:$8 sps:$4 sm:$0xff]   ;;  %v1801_v38 = vld [vmem:[#allocation6 + $0x20] sm:$0xff]   ;;  %v1761_v40 = vld [vmem:[#allocation3 + $0xd0] ss:$8 sps:$4 sm:$0xff]  }
  0x5c   :  { %424 = vmatpush1.bf16.msra.mxu0 %v1731_v7  ;;  %1621 = vmatpush3.bf16.msra.mxu1 %v1795_v26  ;;  %v1762_v41 = vld [vmem:[#allocation3 + $0xe4] ss:$8 sps:$4 sm:$0xff]   ;;  %v1764_v43 = vld [vmem:[#allocation3 + $0xe0] ss:$8 sps:$4 sm:$0xff]   ;;  %v1765_v44 = vld [vmem:[#allocation3 + $0xf4] ss:$8 sps:$4 sm:$0xff]  }
  0x5d   :  { %425 = vmatprep.subr.bf16.mxu0 %v1732_v8  ;;  %1622 = vmatprep.subr.bf16.mxu1 %v1796_v27  ;;  %v1803_v42 = vld [vmem:[#allocation6 + $0x28] sm:$0xff]   ;;  %v1767_v45 = vld [vmem:[#allocation3 + $0xf0] ss:$8 sps:$4 sm:$0xff]   ;;  %v111_v46 = vld [vmem:[%s2324_s29] sm:$0xff]  ;;  %v2058_v7 = vmov 0.0   ;;  %v167_v8 = vlaneseq }
  0x5e   :  { %v1770_v47 = vld [vmem:[#allocation3 + $0x104] ss:$8 sps:$4 sm:$0xff]   ;;  %v1768_v48 = vld [vmem:[#allocation3 + $0x100] ss:$8 sps:$4 sm:$0xff]   ;;  %v114_v49 = vpack.c.bf16 %v111_v46, %v111_v46  ;;  %v1773_v50 = vld [vmem:[#allocation3 + $0x114] ss:$8 sps:$4 sm:$0xff]  }
  0x5f   :  { %v1771_v51 = vld [vmem:[#allocation3 + $0x110] ss:$8 sps:$4 sm:$0xff]   ;;  %v1776_v52 = vld [vmem:[#allocation3 + $0x124] ss:$8 sps:$4 sm:$0xff]   ;;  %v1774_v54 = vld [vmem:[#allocation3 + $0x120] ss:$8 sps:$4 sm:$0xff]  }
  0x60   :  { %426 = vmatpush1.bf16.msra.mxu0 %v1734_v9  ;;  %1623 = vmatpush3.bf16.msra.mxu1 %v1797_v30  ;;  %v1779_v55 = vld [vmem:[#allocation3 + $0x134] ss:$8 sps:$4 sm:$0xff]   ;;  %v1777_v56 = vld [vmem:[#allocation3 + $0x130] ss:$8 sps:$4 sm:$0xff]   ;;  %v1782_v57 = vld [vmem:[#allocation3 + $0x144] ss:$8 sps:$4 sm:$0xff]  }
  0x61   :  { %427 = vmatprep.subr.bf16.mxu0 %v1735_v10  ;;  %1624 = vmatprep.subr.bf16.mxu1 %v1798_v31  ;;  %v1780_v58 = vld [vmem:[#allocation3 + $0x140] ss:$8 sps:$4 sm:$0xff]   ;;  %v1785_v59 = vld [vmem:[#allocation3 + $0x154] ss:$8 sps:$4 sm:$0xff]   ;;  %v1783_v60 = vld [vmem:[#allocation3 + $0x150] ss:$8 sps:$4 sm:$0xff]  }
  0x62   :  { %v1788_v61 = vld [vmem:[#allocation3 + $0x164] ss:$8 sps:$4 sm:$0xff]   ;;  %v1786_v62 = vld [vmem:[#allocation3 + $0x160] ss:$8 sps:$4 sm:$0xff]   ;;  %v1791_v63 = vld [vmem:[#allocation3 + $0x174] ss:$8 sps:$4 sm:$0xff]  }
  0x63   :  { %v1789_v0 = vld [vmem:[#allocation3 + $0x170] ss:$8 sps:$4 sm:$0xff]   ;;  %v2212_v9 = vshrl.u32 %v167_v8, 7  ;;  %v1808_v24 = vld [vmem:[%s2310_s5] sm:$0xff]   ;;  %v1809_v26 = vld [vmem:[%s2310_s5 + $0x8] sm:$0xff]  }
  0x64   :  { %428 = vmatpush1.bf16.msra.mxu0 %v1737_v11  ;;  %1625 = vmatpush3.bf16.msra.mxu1 %v1799_v34  ;;  %v113_v1 = vld [vmem:[%s2324_s29 + $0x10] sm:$0xff]  ;;  %v1806_v5 = vld [vmem:[#allocation6 + $0x78] sm:$0xff]   ;;  %v165_v11 = vld [vmem:[%s2307_s2] sm:$0x3] }
  0x65   :  { %429 = vmatprep.subr.bf16.mxu0 %v1738_v12  ;;  %1626 = vmatprep.subr.bf16.mxu1 %v1800_v36  ;;  %v116_v2 = vpack.c.bf16 %v113_v1, %v113_v1  ;;  %v1804_v3 = vld [vmem:[#allocation6 + $0x70] sm:$0xff]   ;;  %v1807_v6 = vld [vmem:[#allocation6 + $0x38] sm:$0xff]   ;;  %v2215_v10 = vsub.s32 0, %v2212_v9  ;;  %v2221_v12 = vsub.s32 1, %v2212_v9  ;;  %v1813_v30 = vld [vmem:[%s2310_s5 + $0x28] sm:$0xff]  }
  0x66   :  { %v1805_v4 = vld [vmem:[#allocation6 + $0x30] sm:$0xff]   ;;  %v1524_v34 = vld [vmem:[%s2309_s4] ss:$0 sm:$0xff]  ;;  %v1846_v8 = vld [vmem:[#allocation9 + $0x1c] ss:$12 sps:$4 sm:$0xff]  }
  0x67   :  { %v170_v13 = vrot.slane %v165_v11, %v2215_v10  ;;  %v174_v14 = vrot.slane %v165_v11, %v2221_v12  ;;  %v1810_v27 = vld [vmem:[%s2310_s5 + $0x10] sm:$0xff]   ;;  %v1550_v46 = vld [vmem:[%s2312_s7] ss:$0 sm:$0xff]  ;;  %v1844_v11 = vld [vmem:[#allocation9 + $0x18] ss:$12 sps:$4 sm:$0xff]  }
  0x68   :  { %430 = vmatpush1.bf16.msra.mxu0 %v1740_v15  ;;  %1627 = vmatpush3.bf16.msra.mxu1 %v1801_v38  ;;  %v1814_v31 = vld [vmem:[%s2310_s5 + $0x30] sm:$0xff]  }
  0x69   :  { %431 = vmatprep.subr.bf16.mxu0 %v1741_v16  ;;  %1628 = vmatprep.subr.bf16.mxu1 %v1802_v39  ;;  %v1832_v1 = vld [vmem:[#allocation8 + $0x50] ss:$8 sps:$4 sm:$0xff]  }
  0x6c   :  { %432 = vmatpush1.bf16.msra.mxu0 %v1743_v17  ;;  %1629 = vmatpush3.bf16.msra.mxu1 %v1803_v42 }
  0x6d   :  { %433 = vmatprep.subr.bf16.mxu0 %v1744_v18  ;;  %1630 = vmatprep.subr.bf16.mxu1 %v1804_v3  ;;  %v1835_v3 = vld [vmem:[#allocation8 + $0x60] ss:$8 sps:$4 sm:$0xff]  }
  0x70   :  { %434 = vmatpush1.bf16.msra.mxu0 %v1746_v19  ;;  %1631 = vmatpush3.bf16.msra.mxu1 %v1805_v4  ;;  %v1840_v4 = vld [vmem:[#allocation8 + $0x74] ss:$8 sps:$4 sm:$0xff]  }
  0x71   :  { %435 = vmatprep.subr.bf16.mxu0 %v1747_v20  ;;  %1632 = vmatprep.subr.bf16.mxu1 %v1806_v5  ;;  %v1838_v5 = vld [vmem:[#allocation8 + $0x70] ss:$8 sps:$4 sm:$0xff]  }
  0x74   :  { %436 = vmatpush1.bf16.msra.mxu0 %v1749_v21  ;;  %1633 = vmatpush3.bf16.msra.mxu1 %v1807_v6  ;;  %v1841_v6 = vld [vmem:[#allocation9] ss:$12 sps:$4 sm:$0xff]  }
  0x75   :  { %437 = vmatprep.subr.bf16.mxu0 %v1750_v23  ;;  %1673 = vmatprep.subr.bf16.mxu1 %v2058_v7 }
  0x78   :  { %438 = vmatpush1.bf16.msra.mxu0 %v1752_v28  ;;  %v1811_v28 = vld [vmem:[%s2310_s5 + $0x18] sm:$0xff]  }
  0x79   :  { %439 = vmatprep.subr.bf16.mxu0 %v1753_v29  ;;  %v1812_v29 = vld [vmem:[%s2310_s5 + $0x20] sm:$0xff]  }
  0x7c   :  { %440 = vmatpush1.bf16.msra.mxu0 %v1755_v32  ;;  %v1815_v32 = vld [vmem:[%s2310_s5 + $0x38] sm:$0xff]  }
  0x7d   :  { %441 = vmatprep.subr.bf16.mxu0 %v1756_v33 }
  0x80   :  { %442 = vmatpush1.bf16.msra.mxu0 %v1758_v35 }
  0x81   :  { %443 = vmatprep.subr.bf16.mxu0 %v1759_v37 }
  0x84   :  { %444 = vmatpush1.bf16.msra.mxu0 %v1761_v40  ;;  %v1816_v40 = vld [vmem:[%s2314_s9] sm:$0x1f]  }
  0x85   :  { %445 = vmatprep.subr.bf16.mxu0 %v1762_v41 }
  0x88   :  { %446 = vmatpush1.bf16.msra.mxu0 %v1764_v43  ;;  %v827_v43 = vsel %vm825_vm1, %v1816_v40, 0 }
  0x89   :  { %447 = vmatprep.subr.bf16.mxu0 %v1765_v44  ;;  %v1541_v44 = vld [vmem:[%s2311_s6] ss:$0 sm:$0xff] }
  0x8c   :  { %448 = vmatpush1.bf16.msra.mxu0 %v1767_v45 }
  0x8d   :  { %458 = vmatprep.subr.bf16.mxu0 %v1770_v47 }
  0x8f   :  { %450 = vmatmul.mubr.bf16.vlgmr.msra.gmra.mrb[0].mxu0 %v114_v49 }
  0x90   :  { %459 = vmatpush1.bf16.msra.mxu0 %v1768_v48  ;;  %490 = vmatprep.mubr.bf16.mxu0 %v2057_v53 }
  0x91   :  { %460 = vmatprep.subr.bf16.mxu0 %v1773_v50 }
  0x94   :  { %461 = vmatpush1.bf16.msra.mxu0 %v1771_v51 }
  0x95   :  { %462 = vmatprep.subr.bf16.mxu0 %v1776_v52 }
  0x98   :  { %463 = vmatpush1.bf16.msra.mxu0 %v1774_v54 }
  0x99   :  { %464 = vmatprep.subr.bf16.mxu0 %v1779_v55  ;;  %v1817_v55 = vld [vmem:[#allocation8] ss:$8 sps:$4 sm:$0xff]  }
  0x9c   :  { %465 = vmatpush1.bf16.msra.mxu0 %v1777_v56  ;;  %v1819_v56 = vld [vmem:[#allocation8 + $0x4] ss:$8 sps:$4 sm:$0xff]  }
  0x9d   :  { %466 = vmatprep.subr.bf16.mxu0 %v1782_v57  ;;  %v1822_v57 = vld [vmem:[#allocation8 + $0x14] ss:$8 sps:$4 sm:$0xff]  }
  0xa0   :  { %467 = vmatpush1.bf16.msra.mxu0 %v1780_v58  ;;  %v1820_v58 = vld [vmem:[#allocation8 + $0x10] ss:$8 sps:$4 sm:$0xff]  }
  0xa1   :  { %468 = vmatprep.subr.bf16.mxu0 %v1785_v59  ;;  %v1825_v59 = vld [vmem:[#allocation8 + $0x24] ss:$8 sps:$4 sm:$0xff]  }
  0xa4   :  { %469 = vmatpush1.bf16.msra.mxu0 %v1783_v60  ;;  %v1823_v60 = vld [vmem:[#allocation8 + $0x20] ss:$8 sps:$4 sm:$0xff]  }
  0xa5   :  { %470 = vmatprep.subr.bf16.mxu0 %v1788_v61  ;;  %v1828_v61 = vld [vmem:[#allocation8 + $0x34] ss:$8 sps:$4 sm:$0xff]  }
  0xa8   :  { %471 = vmatpush1.bf16.msra.mxu0 %v1786_v62  ;;  %v1826_v62 = vld [vmem:[#allocation8 + $0x30] ss:$8 sps:$4 sm:$0xff]  }
  0xa9   :  { %472 = vmatprep.subr.bf16.mxu0 %v1791_v63  ;;  %v1831_v63 = vld [vmem:[#allocation8 + $0x44] ss:$8 sps:$4 sm:$0xff]  }
  0xac   :  { %473 = vmatpush1.bf16.msra.mxu0 %v1789_v0  ;;  %v1829_v0 = vld [vmem:[#allocation8 + $0x40] ss:$8 sps:$4 sm:$0xff]  }
  0xaf   :  { %491 = vmatmul.mubr.bf16.vlgmr.msra.gmra.mrb[0].mxu0 %v116_v2  ;;  %v1837_v2 = vld [vmem:[#allocation8 + $0x64] ss:$8 sps:$4 sm:$0xff]  }
 0x182   :  { %v492_v15 = vpop.f32.mrb[0].mxu0 }
 0x183   :  { %v1699_v16 = vadd.f32 %v492_v15, %v170_v13  ;;  %v494_v17 = vpop.f32.mrb[1].mxu0  ;;  %v1849_v13 = vld [vmem:[#allocation9 + $0x34] ss:$12 sps:$4 sm:$0xff]   ;;  %v1847_v15 = vld [vmem:[#allocation9 + $0x30] ss:$12 sps:$4 sm:$0xff]  }
 0x184   :  { %v1700_v18 = vadd.f32 %v494_v17, %v174_v14  ;;  %v496_v19 = vpop.f32.mrb[2].mxu0  ;;  %v1868_v14 = vld [vmem:[#allocation9 + $0xc8] ss:$12 sps:$4 sm:$0xff]  }
 0x185   :  { %v499_v20 = vmax.f32 %v1699_v16, 0.0  ;;  %v497_v21 = vpop.f32.mrb[3].mxu0  ;;  %v1852_v16 = vld [vmem:[#allocation9 + $0x4c] ss:$12 sps:$4 sm:$0xff]   ;;  %v1850_v17 = vld [vmem:[#allocation9 + $0x48] ss:$12 sps:$4 sm:$0xff]  }
 0x186   :  { %v500_v22 = vmax.f32 %v1700_v18, 0.0  ;;  %v1855_v18 = vld [vmem:[#allocation9 + $0x64] ss:$12 sps:$4 sm:$0xff]   ;;  %v1853_v19 = vld [vmem:[#allocation9 + $0x60] ss:$12 sps:$4 sm:$0xff]  }
 0x187   :  { %v501_v25 = vpack.c.bf16 %v499_v20, %v499_v20  ;;  %v1858_v20 = vld [vmem:[#allocation9 + $0x7c] ss:$12 sps:$4 sm:$0xff]   ;;  %v1856_v21 = vld [vmem:[#allocation9 + $0x78] ss:$12 sps:$4 sm:$0xff]  }
 0x188   :  { %v502_v23 = vpack.c.bf16 %v500_v22, %v500_v22  ;;  %v1861_v22 = vld [vmem:[#allocation9 + $0x94] ss:$12 sps:$4 sm:$0xff]  }
 0x18a   :  { %670 = vmatprep.mubr.bf16.mxu1 %v502_v23  ;;  %v1859_v23 = vld [vmem:[#allocation9 + $0x90] ss:$12 sps:$4 sm:$0xff]  }
 0x18b   :  { %671 = vmatmul.mubr.bf16.vlgmr.msra.gmra.mrb[0].mxu1 %v501_v25  ;;  %v1862_v25 = vld [vmem:[#allocation9 + $0xa8] ss:$12 sps:$4 sm:$0xff]  }
 0x18c   :  { %1674 = vmatpush3.bf16.msra.mxu1 %v1808_v24  ;;  %1689 = vmatprep.mubr.msk.bf16.mxu1 %vm2059_vm0, %v2058_v7  ;;  %v1864_v24 = vld [vmem:[#allocation9 + $0xac] ss:$12 sps:$4 sm:$0xff]  }
 0x18d   :  { %1675 = vmatprep.subr.bf16.mxu1 %v2058_v7 }
 0x190   :  { %1676 = vmatpush3.bf16.msra.mxu1 %v1809_v26  ;;  %v1867_v26 = vld [vmem:[#allocation9 + $0xc4] ss:$12 sps:$4 sm:$0xff]  }
 0x191   :  { %1677 = vmatprep.subr.bf16.mxu1 %v2058_v7 }
 0x194   :  { %1678 = vmatpush3.bf16.msra.mxu1 %v1810_v27  ;;  %v1865_v27 = vld [vmem:[#allocation9 + $0xc0] ss:$12 sps:$4 sm:$0xff]  }
 0x195   :  { %1679 = vmatprep.subr.bf16.mxu1 %v2058_v7 }
 0x198   :  { %1680 = vmatpush3.bf16.msra.mxu1 %v1811_v28  ;;  %v1872_v28 = vld [vmem:[#allocation9 + $0xdc] ss:$12 sps:$4 sm:$0xff]  }
 0x199   :  { %1681 = vmatprep.subr.bf16.mxu1 %v2058_v7 }
 0x19c   :  { %1682 = vmatpush3.bf16.msra.mxu1 %v1812_v29  ;;  %v1870_v29 = vld [vmem:[#allocation9 + $0xd8] ss:$12 sps:$4 sm:$0xff]  }
 0x19d   :  { %1683 = vmatprep.subr.bf16.mxu1 %v2058_v7 }
 0x1a0   :  { %1684 = vmatpush3.bf16.msra.mxu1 %v1813_v30  ;;  %v1877_v30 = vld [vmem:[#allocation9 + $0xf4] ss:$12 sps:$4 sm:$0xff]  }
 0x1a1   :  { %1685 = vmatprep.subr.bf16.mxu1 %v2058_v7 }
 0x1a4   :  { %1686 = vmatpush3.bf16.msra.mxu1 %v1814_v31  ;;  %v1875_v31 = vld [vmem:[#allocation9 + $0xf0] ss:$12 sps:$4 sm:$0xff]  }
 0x1a5   :  { %1687 = vmatprep.subr.bf16.mxu1 %v2058_v7 }
 0x1a8   :  { %1688 = vmatpush3.bf16.msra.mxu1 %v1815_v32  ;;  %v1882_v32 = vld [vmem:[#allocation9 + $0x10c] ss:$12 sps:$4 sm:$0xff]  }
 0x1a9   :  { %1693 = vmatprep.subr.bf16.mxu1 %v2058_v7 }
 0x25e   :  { %v1634_v33 = vpop.f32.mrb[0].mxu1 }
 0x25f   :  { %v1635_v35 = vpop.f32.mrb[1].mxu1 }
 0x260   :  { %v1636_v36 = vadd.f32 %v1635_v35, %v1634_v33  ;;  %v1637_v37 = vpop.f32.mrb[2].mxu1  ;;  %v1880_v33 = vld [vmem:[#allocation9 + $0x108] ss:$12 sps:$4 sm:$0xff]   ;;  %v1885_v35 = vld [vmem:[#allocation9 + $0x120] ss:$12 sps:$4 sm:$0xff]  }
 0x261   :  { %v1638_v38 = vpop.f32.mrb[3].mxu1  ;;  %v804_v37 = vstv %s2313_s8 }
 0x262   :  { %v673_v39 = vadd.f32 %v1636_v36, %v1524_v34  ;;  %v1887_v34 = vld [vmem:[#allocation9 + $0x124] ss:$12 sps:$4 sm:$0xff]   ;;  %v1892_v36 = vld [vmem:[#allocation9 + $0x13c] ss:$12 sps:$4 sm:$0xff]  }
 0x263   :  { %v1890_v38 = vld [vmem:[#allocation9 + $0x138] ss:$12 sps:$4 sm:$0xff]  }
 0x264   :  { %v678_v41 = vmax.f32 %v673_v39, 0.0 }
 0x266   :  { %v679_v42 = vpack.c.bf16 %v678_v41, %v678_v41  ;;  %v1551_v41 = vld [vmem:[%s2315_s10] ss:$0 sm:$0xff] }
 0x268   :  { %1690 = vmatmul.mubr.bf16.vlgmr.msra.gmra.mrb[4].mxu1 %v679_v42 }
 0x269   :  { %1694 = vmatpush3.bf16.msra.mxu1 %v827_v43  ;;  %1695 = vmatprep.mubr.msk.bf16.mxu1 %vm2059_vm0, %v2058_v7  ;;  %v1843_v7 = vld [vmem:[#allocation9 + $0x4] ss:$12 sps:$4 sm:$0xff]  }
 0x26a   :  { %979 = vmatprep.subr.bf16.mxu1 %v1819_v56  ;;  %1361 = vmatprep.subr.bf16.mxu0 %v1843_v7  ;;  %v1884_v56 = vld [vmem:[#allocation9 + $0x50] ss:$12 sps:$4 sm:$0xff]  }
 0x26b   :  { %1362 = vmatpush1.bf16.msra.mxu0 %v1841_v6 }
 0x26c   :  { %1363 = vmatprep.subr.bf16.mxu0 %v1846_v8 }
 0x26f   :  { %1364 = vmatpush1.bf16.msra.mxu0 %v1844_v11 }
 0x270   :  { %1365 = vmatprep.subr.bf16.mxu0 %v1849_v13 }
 0x273   :  { %1366 = vmatpush1.bf16.msra.mxu0 %v1847_v15 }
 0x274   :  { %1367 = vmatprep.subr.bf16.mxu0 %v1852_v16 }
 0x277   :  { %1368 = vmatpush1.bf16.msra.mxu0 %v1850_v17 }
 0x278   :  { %1369 = vmatprep.subr.bf16.mxu0 %v1855_v18 }
 0x27b   :  { %1370 = vmatpush1.bf16.msra.mxu0 %v1853_v19 }
 0x27c   :  { %1371 = vmatprep.subr.bf16.mxu0 %v1858_v20 }
 0x27f   :  { %1372 = vmatpush1.bf16.msra.mxu0 %v1856_v21 }
 0x280   :  { %1373 = vmatprep.subr.bf16.mxu0 %v1861_v22 }
 0x283   :  { %1374 = vmatpush1.bf16.msra.mxu0 %v1859_v23 }
 0x284   :  { %1375 = vmatprep.subr.bf16.mxu0 %v1864_v24 }
 0x287   :  { %1376 = vmatpush1.bf16.msra.mxu0 %v1862_v25 }
 0x288   :  { %1377 = vmatprep.subr.bf16.mxu0 %v1867_v26 }
 0x28b   :  { %1378 = vmatpush1.bf16.msra.mxu0 %v1865_v27 }
 0x28c   :  { %1379 = vmatprep.subr.bf16.mxu0 %v1872_v28 }
 0x28f   :  { %1380 = vmatpush1.bf16.msra.mxu0 %v1870_v29 }
 0x290   :  { %1381 = vmatprep.subr.bf16.mxu0 %v1877_v30 }
 0x293   :  { %1382 = vmatpush1.bf16.msra.mxu0 %v1875_v31 }
 0x294   :  { %1383 = vmatprep.subr.bf16.mxu0 %v1882_v32 }
 0x297   :  { %1384 = vmatpush1.bf16.msra.mxu0 %v1880_v33 }
 0x298   :  { %1385 = vmatprep.subr.bf16.mxu0 %v1887_v34 }
 0x29b   :  { %1386 = vmatpush1.bf16.msra.mxu0 %v1885_v35 }
 0x29c   :  { %1387 = vmatprep.subr.bf16.mxu0 %v1892_v36 }
 0x29f   :  { %1388 = vmatpush1.bf16.msra.mxu0 %v1890_v38 }
 0x33b   :  { %v785_v45 = vpop.f32.mrb[4].mxu1 }
 0x33c   :  { %v786_v47 = vadd.f32 %v1541_v44, %v785_v45  ;;  %v1691_v48 = vpop.f32.mrb[5].mxu1 }
 0x33d   :  { %v788_v49 = vpop.f32.mrb[6].mxu1  ;;  %v1869_v48 = vld [vmem:[#allocation9 + $0x8] ss:$12 sps:$4 sm:$0xff]  }
 0x33e   :  { %v807_v50 = vpack.c.bf16 %v786_v47, %v786_v47  ;;  %v1692_v51 = vpop.f32.mrb[7].mxu1  ;;  %v798_v52 = vmul.f32 %v1550_v46, %v786_v47 }
 0x33f   :  { %v1874_v51 = vld [vmem:[#allocation9 + $0x20] ss:$12 sps:$4 sm:$0xff]  }
 0x340   :  { %1696 = vmatmul.mubr.msk.bf16.vlgmr.msra.gmra.mrb[8].mxu1 %vm799_vm2, %v807_v50  ;;  %v800_v54 = vsel %vm799_vm2, %v798_v52, 0.0  ;;  %v1873_v50 = vld [vmem:[#allocation9 + $0xe0] ss:$12 sps:$4 sm:$0xff]   ;;  %v1878_v52 = vld [vmem:[#allocation9 + $0xf8] ss:$12 sps:$4 sm:$0xff]  }
 0x341   :  { %801 = vadd.xlane.f32.xlu0 %v800_v54  ;;  %1011 = vmatprep.mubr.bf16.mxu1 %v2057_v53  ;;  %v1834_v53 = vld [vmem:[#allocation8 + $0x54] ss:$8 sps:$4 sm:$0xff]   ;;  %v1879_v54 = vld [vmem:[#allocation9 + $0x38] ss:$12 sps:$4 sm:$0xff]  }
 0x342   :  { %980 = vmatpush1.bf16.msra.mxu1 %v1817_v55  ;;  %v1883_v55 = vld [vmem:[#allocation9 + $0x110] ss:$12 sps:$4 sm:$0xff]  }
 0x343   :  { %981 = vmatprep.subr.bf16.mxu1 %v1822_v57  ;;  %v1888_v57 = vld [vmem:[#allocation9 + $0x128] ss:$12 sps:$4 sm:$0xff]  }
 0x346   :  { %982 = vmatpush1.bf16.msra.mxu1 %v1820_v58  ;;  %v1889_v58 = vld [vmem:[#allocation9 + $0x68] ss:$12 sps:$4 sm:$0xff]  }
 0x347   :  { %983 = vmatprep.subr.bf16.mxu1 %v1825_v59  ;;  %v1893_v59 = vld [vmem:[#allocation9 + $0x140] ss:$12 sps:$4 sm:$0xff]  }
 0x34a   :  { %984 = vmatpush1.bf16.msra.mxu1 %v1823_v60  ;;  %v1894_v60 = vld [vmem:[#allocation9 + $0x80] ss:$12 sps:$4 sm:$0xff]  }
 0x34b   :  { %985 = vmatprep.subr.bf16.mxu1 %v1828_v61  ;;  %v1897_v61 = vld [vmem:[#allocation9 + $0x154] ss:$12 sps:$4 sm:$0xff]  }
 0x34c   :  { %1389 = vmatprep.subr.bf16.mxu0 %v1897_v61 }
 0x34e   :  { %986 = vmatpush1.bf16.msra.mxu1 %v1826_v62  ;;  %v1898_v62 = vld [vmem:[#allocation9 + $0x158] ss:$12 sps:$4 sm:$0xff]  }
 0x34f   :  { %987 = vmatprep.subr.bf16.mxu1 %v1831_v63  ;;  %v1895_v63 = vld [vmem:[#allocation9 + $0x150] ss:$12 sps:$4 sm:$0xff]  }
 0x350   :  { %1390 = vmatpush1.bf16.msra.mxu0 %v1895_v63 }
 0x352   :  { %988 = vmatpush1.bf16.msra.mxu1 %v1829_v0  ;;  %v1899_v0 = vld [vmem:[#allocation9 + $0x98] ss:$12 sps:$4 sm:$0xff]  }
 0x353   :  { %989 = vmatprep.subr.bf16.mxu1 %v1834_v53  ;;  %v1902_v53 = vld [vmem:[#allocation9 + $0x16c] ss:$12 sps:$4 sm:$0xff]  }
 0x354   :  { %1391 = vmatprep.subr.bf16.mxu0 %v1902_v53 }
 0x356   :  { %990 = vmatpush1.bf16.msra.mxu1 %v1832_v1  ;;  %v1903_v1 = vld [vmem:[#allocation9 + $0x170] ss:$12 sps:$4 sm:$0xff]  }
 0x357   :  { %991 = vmatprep.subr.bf16.mxu1 %v1837_v2  ;;  %v1900_v2 = vld [vmem:[#allocation9 + $0x168] ss:$12 sps:$4 sm:$0xff]  }
 0x358   :  { %1392 = vmatpush1.bf16.msra.mxu0 %v1900_v2 }
 0x35a   :  { %992 = vmatpush1.bf16.msra.mxu1 %v1835_v3  ;;  %v1904_v3 = vld [vmem:[#allocation9 + $0xb0] ss:$12 sps:$4 sm:$0xff]  }
 0x35b   :  { %993 = vmatprep.subr.bf16.mxu1 %v1840_v4  ;;  %v887_v4 = vld [vmem:[%s2317_s12] sm:$0x3]  ;;  %s1451_s12 = sshll.u32 %s2060_s25, 4  ;;  %s1452_s12 = int_to_ptr.vmem [resolvable:$true] %s1451_s12 }
 0x35c   :  { %v896_v6 = vrot.slane %v887_v4, %v2221_v12  ;;  %s1993_s26 = scalar_lea.vmem %s1452_s12, 128  ;;  %p1998_p5 = scmp.lt.s32.totalorder %s1452_s12, %s1452_s12 }
 0x35d   :  { %p1994_p4 = scmp.ne.s32.totalorder %s1452_s12, %s1993_s26  ;;  %p1999_p6 = scmp.lt.s32.totalorder %s1993_s26, %s1993_s26 }
 0x35e   :  { %994 = vmatpush1.bf16.msra.mxu1 %v1838_v5  ;;  %v892_v5 = vrot.slane %v887_v4, %v2215_v10 }
 0x35f   :  { %1651 = vmatprep.subr.bf16.mxu1 %v1868_v14  ;;  %p2000_p7 = por %p1999_p6, %p1998_p5 }
 0x361   :  { %p2001_p8 = pnand %p2000_p7, %p1994_p4 }
 0x3ce   :  { %v802_v39 = vpop.xlane.xlu0 %801 }
 0x3cf   :  { %v805_v40 = vadd.f32 %v804_v37, %v802_v39 }
 0x3d1   :  { %806 = vst [vmem:[#allocation11] sm:$0xff] %v805_v40 }
 0x413   :  { %v863_v42 = vpop.f32.mrb[8].mxu1 }
 0x414   :  { %v864_v43 = vadd.f32 %v1551_v41, %v863_v42  ;;  %v1697_v44 = vpop.f32.mrb[9].mxu1 }
 0x415   :  { %v866_v45 = vpop.f32.mrb[10].mxu1 }
 0x416   :  { %v869_v46 = vmax.f32 %v864_v43, 0.0  ;;  %v1698_v47 = vpop.f32.mrb[11].mxu1 }
 0x418   :  { %v870_v49 = vpack.c.bf16 %v869_v46, %v869_v46 }
 0x41a   :  { %1012 = vmatmul.mubr.bf16.vlgmr.msra.gmra.mrb[12].mxu1 %v870_v49 }
 0x41b   :  { %1652 = vmatpush3.bf16.msra.mxu1 %v1869_v48 }
 0x41c   :  { %1653 = vmatprep.subr.bf16.mxu1 %v1873_v50 }
 0x41f   :  { %1654 = vmatpush3.bf16.msra.mxu1 %v1874_v51 }
 0x420   :  { %1655 = vmatprep.subr.bf16.mxu1 %v1878_v52 }
 0x423   :  { %1656 = vmatpush3.bf16.msra.mxu1 %v1879_v54 }
 0x424   :  { %1657 = vmatprep.subr.bf16.mxu1 %v1883_v55 }
 0x427   :  { %1658 = vmatpush3.bf16.msra.mxu1 %v1884_v56 }
 0x428   :  { %1659 = vmatprep.subr.bf16.mxu1 %v1888_v57 }
 0x42b   :  { %1660 = vmatpush3.bf16.msra.mxu1 %v1889_v58 }
 0x42c   :  { %1661 = vmatprep.subr.bf16.mxu1 %v1893_v59 }
 0x42f   :  { %1662 = vmatpush3.bf16.msra.mxu1 %v1894_v60 }
 0x430   :  { %1663 = vmatprep.subr.bf16.mxu1 %v1898_v62 }
 0x433   :  { %1664 = vmatpush3.bf16.msra.mxu1 %v1899_v0 }
 0x434   :  { %1665 = vmatprep.subr.bf16.mxu1 %v1903_v1 }
 0x437   :  { %1666 = vmatpush3.bf16.msra.mxu1 %v1904_v3 }
 0x4ed   :  { %v1013_v7 = vpop.f32.mrb[12].mxu1 }
 0x4ee   :  { %v1014_v8 = vadd.f32 %v1013_v7, %v892_v5  ;;  %v1015_v11 = vpop.f32.mrb[13].mxu1 }
 0x4ef   :  { %v1016_v13 = vadd.f32 %v1015_v11, %v896_v6  ;;  %v1017_v14 = vpop.f32.mrb[14].mxu1 }
 0x4f0   :  { %v1020_v15 = vmax.f32 %v1014_v8, 0.0  ;;  %v1018_v16 = vpop.f32.mrb[15].mxu1 }
 0x4f1   :  { %v1021_v17 = vmax.f32 %v1016_v13, 0.0 }
 0x4f2   :  { %v1022_v19 = vpack.c.bf16 %v1020_v15, %v1020_v15 }
 0x4f3   :  { %v1023_v18 = vpack.c.bf16 %v1021_v17, %v1021_v17 }
 0x4f5   :  { %1393 = vmatprep.mubr.bf16.mxu0 %v1023_v18  ;;  %1434 = vmatprep.mubr.bf16.mxu1 %v1023_v18 }
 0x4f6   :  { %1394 = vmatmul.mubr.bf16.vlgmr.msra.gmra.mrb[4].mxu0 %v1022_v19  ;;  %1435 = vmatmul.mubr.bf16.vlgmr.msra.gmra.mrb[16].mxu1 %v1022_v19 }
 0x4f7   :  { %2004 = shalt.err (!%p2001_p8)
}
 0x4f8   :  { %s2005_s11 = scalar_lea.hbm %s2320_s15, 128 }
 0x4f9   :  { %p2006_p9 = scmp.ne.s32.totalorder %s2320_s15, %s2005_s11  ;;  %p2009_p10 = scmp.lt.u32.totalorder %s2005_s11, %s2320_s15 }
 0x4fb   :  { %p2011_p11 = pnand %p2009_p10, %p2006_p9 }
 0x4fd   :  { %2014 = shalt.err (!%p2011_p11)
}
 0x4fe   :  { %1454 = dma.vmem_to_hbm [thread:$0]  %s1452_s12, 128, %s2320_s15, [#allocation5]   ;;  %v1088_v20 = vld [vmem:[%s2319_s14] sm:$0x7]  ;;  %v1100_v21 = vsub.s32 2, %v2212_v9 }
 0x4ff   :  { %v1093_v22 = vrot.slane %v1088_v20, %v2215_v10  ;;  %v1097_v23 = vrot.slane %v1088_v20, %v2221_v12  ;;  %s2061_s21 = smov [#allocation12]  }
 0x500   :  { %v1101_v26 = vrot.slane %v1088_v20, %v1100_v21  ;;  %s1461_s0 = sshll.u32 %s2061_s21, 4  ;;  %s1462_s0 = int_to_ptr.vmem [resolvable:$true] %s1461_s0 }
 0x501   :  { %s2015_s14 = scalar_lea.vmem %s1462_s0, 384  ;;  %p2020_p13 = scmp.lt.s32.totalorder %s1462_s0, %s1462_s0 }
 0x502   :  { %p2016_p12 = scmp.ne.s32.totalorder %s1462_s0, %s2015_s14  ;;  %p2021_p0 = scmp.lt.s32.totalorder %s2015_s14, %s2015_s14 }
 0x504   :  { %p2022_p1 = por %p2021_p0, %p2020_p13 }
 0x506   :  { %p2023_p2 = pnand %p2022_p1, %p2016_p12 }
 0x5c9   :  { %v1395_v24 = vpop.f32.mrb[4].mxu0  ;;  %v1667_v25 = vpop.f32.mrb[16].mxu1 }
 0x5ca   :  { %v1396_v27 = vadd.f32 %v1395_v24, %v1093_v22  ;;  %v1397_v28 = vpop.f32.mrb[5].mxu0  ;;  %v1668_v29 = vpop.f32.mrb[17].mxu1 }
 0x5cb   :  { %v1398_v30 = vadd.f32 %v1397_v28, %v1097_v23  ;;  %v1669_v31 = vadd.f32 %v1668_v29, %v1667_v25  ;;  %v1399_v32 = vpop.f32.mrb[6].mxu0  ;;  %v1670_v33 = vpop.f32.mrb[18].mxu1 }
 0x5cc   :  { %1442 = vst [vmem:[#allocation12] sm:$0xff] %v1396_v27  ;;  %v1400_v34 = vpop.f32.mrb[7].mxu0  ;;  %v1671_v35 = vpop.f32.mrb[19].mxu1 }
 0x5cd   :  { %1443 = vst [vmem:[#allocation12 + $0x8] sm:$0xff] %v1398_v30  ;;  %v1437_v9 = vadd.f32 %v1669_v31, %v1101_v26 }
 0x5cf   :  { %1444 = vst [vmem:[#allocation12 + $0x10] sm:$0xff] %v1437_v9 }
 0x5d0   :  { %2026 = shalt.err (!%p2023_p2)
}
 0x5d1   :  { %s2027_s18 = scalar_lea.hbm %s2321_s16, 384 }
 0x5d2   :  { %p2028_p3 = scmp.ne.s32.totalorder %s2321_s16, %s2027_s18  ;;  %p2031_p4 = scmp.lt.u32.totalorder %s2027_s18, %s2321_s16 }
 0x5d4   :  { %p2033_p5 = pnand %p2031_p4, %p2028_p3 }
 0x5d6   :  { %2036 = shalt.err (!%p2033_p5)
}
 0x5d7   :  { %1464 = dma.vmem_to_hbm [thread:$0]  %s1462_s0, 384, %s2321_s16, [#allocation13]  }
 0x5d8   :  { %2043 = dma.done.wait [#allocation5], 128  }
 0x5d9   :  { %2044 = vsyncadd [#allocation5], 4294967168 }
 0x5da   :  { %2045 = dma.done.wait [#allocation13], 384  }
 0x5db   :  { %2046 = vsyncadd [#allocation13], 4294966912 }
 0x5dc   :  { %1471 = vsyncpa [#allocation4], 1 }
 0x5dd   :  { %1472 = vsyncpa [#allocation7], 1 }
 0x5de   :  { %1473 = vsyncpa [#allocation10], 1 }
 0x5df   :  { %1474 = vsyncpa [#allocation5], 1 }
 0x5e0   :  { %1475 = vsyncpa [#allocation13], 1 }

</bundles_post_ra>
